<compile_context>
chip_gen: v6e
topology: v6e:2x2x1
jax: 0.10.0
libtpu: 0.0.40
codegen_flags: <defaults>
</compile_context>

<pallas_src>
import jax
import jax.numpy as jnp
from jax.experimental import pallas as pl
from jax.experimental.pallas import tpu as pltpu

# MLP dims from the module: 1024 -> 512 -> 256 -> 128 -> 64 -> 1, then sigmoid.
DIMS = (1024, 512, 256, 128, 64, 1)
LANE = 128  # TPU vreg lane width: keep all matmul operands / output lane-dense.


def _round_up(x, m):
    return ((x + m - 1) // m) * m


# ----------------------------------------------------------------------------
# Kernels
# ----------------------------------------------------------------------------
def _folded_kernel(x_ref, w_ref, b_ref, o_ref):
    """(TB,1024) @ (1024,128 zero-padded) + bias, then sigmoid (lane-dense out)."""
    h = jnp.dot(x_ref[...], w_ref[...], preferred_element_type=jnp.float32)
    o_ref[...] = jax.nn.sigmoid(h + b_ref[...]).astype(o_ref.dtype)


def _layered_kernel(x_ref,
                    w1_ref, b1_ref, w2_ref, b2_ref, w3_ref, b3_ref,
                    w4_ref, b4_ref, w5_ref, b5_ref, o_ref):
    """Fused 5-layer linear chain + sigmoid; tail layers zero-padded to 128 lanes."""
    h = x_ref[...]
    for w_ref, b_ref in ((w1_ref, b1_ref), (w2_ref, b2_ref), (w3_ref, b3_ref),
                         (w4_ref, b4_ref), (w5_ref, b5_ref)):
        h = jnp.dot(h, w_ref[...], preferred_element_type=jnp.float32) + b_ref[...]
    o_ref[...] = jax.nn.sigmoid(h).astype(o_ref.dtype)


# ----------------------------------------------------------------------------
# Parameter packing (done once, outside the kernel)
# ----------------------------------------------------------------------------
def _pack_folded(params):
    """Fold the activation-free chain into a single (1024, 1) matvec + bias,
    then zero-pad the output dim to LANE for an unmasked, lane-dense store."""
    hi = jax.lax.Precision.HIGHEST
    w_eff, b_eff = params[0]                       # (1024, 512), (512,)
    for w_t, b in params[1:]:
        b_eff = jnp.dot(b_eff, w_t, precision=hi) + b
        w_eff = jnp.dot(w_eff, w_t, precision=hi)
    w_pad = jnp.zeros((DIMS[0], LANE), jnp.float32).at[:, :w_eff.shape[1]].set(w_eff)
    b_pad = jnp.zeros((1, LANE), jnp.float32).at[0, :b_eff.shape[0]].set(b_eff)
    return w_pad, b_pad


def _pack_layered(params):
    """Zero-pad every layer to multiples of the 128-lane width (only the last
    two layers actually change: 128->64 and 64->1 become 128->128, 128->128)."""
    packed = []
    for w_t, b in params:
        d_in, d_out = w_t.shape
        d_in_p, d_out_p = _round_up(d_in, LANE), _round_up(d_out, LANE)
        w_p = jnp.zeros((d_in_p, d_out_p), jnp.float32).at[:d_in, :d_out].set(w_t)
        b_p = jnp.zeros((1, d_out_p), jnp.float32).at[0, :d_out].set(b)
        packed.append((w_p, b_p))
    return packed


# ----------------------------------------------------------------------------
# Forward
# ----------------------------------------------------------------------------
def modified_model_forward(x, params, *, fold=True, block_b=256):
    """x: (B, 1024) f32 encoder output. params: list of (W_t=(in,out), b=(out,))."""
    B, D = x.shape
    assert D == DIMS[0]

    # Batch tile: 256 fills the v6e/v7x MXU rows (128 is enough on v5e) while
    # keeping the double-buffered working set well under v7x's 32 MiB scoped
    # VMEM.  Shrink (multiple of 8 sublanes) for tiny batches.
    tb = min(block_b, _round_up(B, 8))
    b_padded = _round_up(B, tb)
    if b_padded != B:
        x = jnp.pad(x, ((0, b_padded - B), (0, 0)))
    grid = (b_padded // tb,)

    x_spec = pl.BlockSpec((tb, D), lambda i: (i, 0))
    out_spec = pl.BlockSpec((tb, LANE), lambda i: (i, 0))
    const = lambda i: (0, 0)  # weights/biases stay VMEM-resident across the grid

    if fold:
        w_pad, b_vec = _pack_folded(params)
        kernel = _folded_kernel
        flat_args = [x, w_pad, b_vec]
        in_specs = [x_spec,
                    pl.BlockSpec(w_pad.shape, const),
                    pl.BlockSpec(b_vec.shape, const)]
        flops = 2 * b_padded * D * LANE
        weight_bytes = (w_pad.size + b_vec.size) * 4
    else:
        packed = _pack_layered(params)
        kernel = _layered_kernel
        flat_args = [x]
        in_specs = [x_spec]
        flops = 0
        weight_bytes = 0
        for w_p, b_p in packed:
            flat_args += [w_p, b_p]
            in_specs += [pl.BlockSpec(w_p.shape, const),
                         pl.BlockSpec(b_p.shape, const)]
            flops += 2 * b_padded * w_p.shape[0] * w_p.shape[1]
            weight_bytes += (w_p.size + b_p.size) * 4

    cost = pl.CostEstimate(
        flops=flops,
        transcendentals=b_padded * LANE,
        bytes_accessed=weight_bytes + (b_padded * D + b_padded * LANE) * 4,
    )

    out = pl.pallas_call(
        kernel,
        out_shape=jax.ShapeDtypeStruct((b_padded, LANE), jnp.float32),
        grid=grid,
        in_specs=in_specs,
        out_specs=out_spec,
        compiler_params=pltpu.CompilerParams(
            dimension_semantics=("parallel",)),  # use v7x's 2nd TensorCore
        cost_estimate=cost,
    )(*flat_args)

    # Strip batch padding and the 128-lane output padding.
    return out[:B, :1]


# ----------------------------------------------------------------------------
# Parameter construction (matches the torch init) + pure-JAX reference
# ----------------------------------------------------------------------------
def _xavier_uniform(key, fan_out, fan_in):
    """Matches torch.nn.init.xavier_uniform_ for a (out, in) Linear weight."""
    bound = (6.0 / (fan_in + fan_out)) ** 0.5
    return jax.random.uniform(key, (fan_out, fan_in), jnp.float32,
                              minval=-bound, maxval=bound)


def make_params(key):
    params = []
    for i in range(len(DIMS) - 1):
        key, wkey = jax.random.split(key)
        fan_in, fan_out = DIMS[i], DIMS[i + 1]
        w = _xavier_uniform(wkey, fan_out, fan_in)   # torch layout (out, in)
        b = jnp.zeros((fan_out,), jnp.float32)       # init.zeros_
        params.append((w.T, b))                      # store transposed (in, out)
    return params


def reference_forward(x, params):
    h = x
    for w_t, b in params:
        h = h @ w_t + b
    return jax.nn.sigmoid(h)


if __name__ == "__main__":
    key = jax.random.PRNGKey(0)
    key, xkey = jax.random.split(key)

    B = 8  # small batch; encoder output dim fixed at 1024 by fc1
    x = jax.random.normal(xkey, (B, DIMS[0]), jnp.float32)
    params = make_params(key)

    ref = reference_forward(x, params)

    out_fast = jax.block_until_ready(modified_model_forward(x, params, fold=True))
    out_layered = jax.block_until_ready(modified_model_forward(x, params, fold=False))

    assert out_fast.shape == (B, 1)
    assert out_layered.shape == (B, 1)
    assert jnp.allclose(out_layered, ref, atol=1e-4, rtol=1e-3), \
        float(jnp.max(jnp.abs(out_layered - ref)))
    assert jnp.allclose(out_fast, ref, atol=2e-4, rtol=1e-3), \
        float(jnp.max(jnp.abs(out_fast - ref)))

    print("KERNEL_OK")
</pallas_src>

<mosaic_0001>
module attributes {stable_mosaic.version = 11 : i64} {
  func.func @_folded_kernel(%arg0: i32, %arg1: memref<8x1024xf32, #tpu.memory_space<vmem>>, %arg2: memref<1024x128xf32, #tpu.memory_space<vmem>>, %arg3: memref<1x128xf32, #tpu.memory_space<vmem>>, %arg4: memref<8x128xf32, #tpu.memory_space<vmem>>) attributes {dimension_semantics = [#tpu.dimension_semantics<parallel>], iteration_bounds = array<i64: 1>, scalar_prefetch = 0 : i64, scratch_operands = 0 : i64, tpu.core_type = #tpu.core_type<tc>, window_params = [{transform_indices = @transform_0, window_bounds = array<i64: 8, 1024>}, {pipeline_mode = #tpu.pipeline_mode<synchronous>, transform_indices = @transform_1, window_bounds = array<i64: 1024, 128>}, {pipeline_mode = #tpu.pipeline_mode<synchronous>, transform_indices = @transform_2, window_bounds = array<i64: 1, 128>}, {transform_indices = @transform_3, window_bounds = array<i64: 8, 128>}]} {
    %c0 = arith.constant 0 : index
    %c0_0 = arith.constant 0 : index
    %0 = vector.load %arg1[%c0, %c0_0] : memref<8x1024xf32, #tpu.memory_space<vmem>>, vector<8x1024xf32>
    %c0_1 = arith.constant 0 : index
    %c0_2 = arith.constant 0 : index
    %1 = vector.load %arg2[%c0_1, %c0_2] : memref<1024x128xf32, #tpu.memory_space<vmem>>, vector<1024x128xf32>
    %cst = arith.constant dense<0.000000e+00> : vector<8x128xf32>
    %2 = tpu.matmul %0, %1, %cst {dimension_numbers = #tpu.dot_dimension_numbers<[1], [0], [0], [1], [0, 0, 1, 1], [], []>} : vector<8x1024xf32>, vector<1024x128xf32>, vector<8x128xf32> -> vector<8x128xf32>
    %c0_3 = arith.constant 0 : index
    %c0_4 = arith.constant 0 : index
    %3 = vector.load %arg3[%c0_3, %c0_4] : memref<1x128xf32, #tpu.memory_space<vmem>>, vector<1x128xf32>
    %4 = vector.broadcast %3 : vector<1x128xf32> to vector<8x128xf32>
    %5 = arith.addf %2, %4 : vector<8x128xf32>
    %6 = arith.negf %5 : vector<8x128xf32>
    %7 = math.exp %6 : vector<8x128xf32>
    %cst_5 = arith.constant 1.000000e+00 : f32
    %8 = vector.broadcast %cst_5 : f32 to vector<8x128xf32>
    %9 = arith.addf %8, %7 : vector<8x128xf32>
    %10 = arith.divf %8, %9 : vector<8x128xf32>
    %c0_6 = arith.constant 0 : index
    %c0_7 = arith.constant 0 : index
    %11 = vector.load %arg4[%c0_6, %c0_7] : memref<8x128xf32, #tpu.memory_space<vmem>>, vector<8x128xf32>
    tpu.vector_store %arg4[%c0_6, %c0_7], %10 {strides = array<i32>} : memref<8x128xf32, #tpu.memory_space<vmem>>, vector<8x128xf32>,
    return
  }
  func.func @transform_0(%arg0: i32) -> (i32, i32) {
    %c0_i32 = arith.constant 0 : i32
    %c0_i32_0 = arith.constant 0 : i32
    return %arg0, %c0_i32 : i32, i32
  }
  func.func @transform_1(%arg0: i32) -> (i32, i32) {
    %c0_i32 = arith.constant 0 : i32
    %c0_i32_0 = arith.constant 0 : i32
    %c0_i32_1 = arith.constant 0 : i32
    return %c0_i32, %c0_i32_0 : i32, i32
  }
  func.func @transform_2(%arg0: i32) -> (i32, i32) {
    %c0_i32 = arith.constant 0 : i32
    %c0_i32_0 = arith.constant 0 : i32
    %c0_i32_1 = arith.constant 0 : i32
    return %c0_i32, %c0_i32_0 : i32, i32
  }
  func.func @transform_3(%arg0: i32) -> (i32, i32) {
    %c0_i32 = arith.constant 0 : i32
    %c0_i32_0 = arith.constant 0 : i32
    return %arg0, %c0_i32 : i32, i32
  }
}

</mosaic_0001>

<bundles_post_ra>
// kernel: tpu_custom_call.1
= control target key start
LH: loop header
LB: loop body
LE: loop exit
PB: predicated region body
PF: predicated region fallthrough
CT: control target
= control target key end

     0   :  { %8 = vsyncpa [#allocation3], 0  ;;  %s741_s0 = inlined_call_operand.hbm [shape: f32[8,1024], index: 0, kind: input, shape index: {}]   ;;  %s742_s1 = inlined_call_operand.hbm [shape: f32[1024,128], index: 1, kind: input, shape index: {}]   ;;  %s743_s2 = inlined_call_operand.vmem [shape: f32[1,128], index: 2, kind: input, shape index: {}]   ;;  %s744_s3 = inlined_call_operand.hbm [shape: f32[8,128], index: 3, kind: output, shape index: {}]  }
   0x1   :  { %9 = vsyncpa [#allocation6], 0 }
   0x2   :  { %10 = vsyncpa [#allocation4], 0  ;;  %s704_s12 = smov [#allocation2]   ;;  %s705_s14 = smov [#allocation5]  }
   0x3   :  { %s17_s13 = sshll.u32 %s704_s12, 4  ;;  %s26_s15 = sshll.u32 %s705_s14, 4  ;;  %s18_s13 = int_to_ptr.vmem [resolvable:$true] %s17_s13  ;;  %s27_s15 = int_to_ptr.vmem [resolvable:$true] %s26_s15 }
   0x4   :  { %s646_s16 = scalar_lea.vmem %s18_s13, 1024  ;;  %p651_p1 = scmp.lt.s32.totalorder %s18_s13, %s18_s13 }
   0x5   :  { %p647_p0 = scmp.ne.s32.totalorder %s18_s13, %s646_s16  ;;  %p652_p2 = scmp.lt.s32.totalorder %s646_s16, %s646_s16 }
   0x7   :  { %p653_p3 = por %p652_p2, %p651_p1 }
   0x9   :  { %p654_p4 = pnand %p653_p3, %p647_p0 }
   0xb   :  { %657 = shalt.err (!%p654_p4)
}
   0xc   :  { %20 = dma.hbm_to_vmem [thread:$0]  %s741_s0, 1024, %s18_s13, [#allocation3]  }
   0xd   :  { %s666_s19 = scalar_lea.vmem %s27_s15, 16384  ;;  %p671_p6 = scmp.lt.s32.totalorder %s27_s15, %s27_s15 }
   0xe   :  { %p667_p5 = scmp.ne.s32.totalorder %s27_s15, %s666_s19  ;;  %p672_p7 = scmp.lt.s32.totalorder %s666_s19, %s666_s19 }
  0x10   :  { %p673_p8 = por %p672_p7, %p671_p6 }
  0x12   :  { %p674_p9 = pnand %p673_p8, %p667_p5 }
  0x14   :  { %677 = shalt.err (!%p674_p9)
}
  0x15   :  { %s706_s20 = smov 128   ;;  %s707_s21 = smov 8  }
  0x16   :  { %32 = dma.hbm_to_vmem [thread:$0]  %s742_s1, 16384, %s27_s15, [#allocation6], %s706_s20, %s706_s20, %s707_s21  }
  0x17   :  { %698 = dma.done.wait [#allocation3], 1024  }
  0x18   :  { %699 = vsyncadd [#allocation3], 4294966272 }
  0x19   :  { %700 = dma.done.wait [#allocation6], 16384  }
  0x1a   :  { %701 = vsyncadd [#allocation6], 4294950912  ;;  %v80_v0 = vld [vmem:[#allocation5 + $0xf8] sm:$0xff]  ;;  %v79_v4 = vld [vmem:[#allocation5 + $0xf0] sm:$0xff]  ;;  %s708_s24 = smov [#allocation7]  }
  0x1b   :  { %v112_v1 = vld [vmem:[#allocation5 + $0x1f8] sm:$0xff]  ;;  %489 = vmatprep.subr.mxu0 %v80_v0  ;;  %v111_v5 = vld [vmem:[#allocation5 + $0x1f0] sm:$0xff]  ;;  %v78_v8 = vld [vmem:[#allocation5 + $0xe8] sm:$0xff]  ;;  %s477_s25 = sshll.u32 %s708_s24, 4  ;;  %s478_s25 = int_to_ptr.vmem [resolvable:$true] %s477_s25 }
  0x1c   :  { %v64_v2 = vld [vmem:[#allocation5 + $0x78] sm:$0xff]  ;;  %524 = vmatprep.subr.mxu1 %v112_v1  ;;  %v63_v6 = vld [vmem:[#allocation5 + $0x70] sm:$0xff]  ;;  %v110_v9 = vld [vmem:[#allocation5 + $0x1e8] sm:$0xff]  ;;  %p683_p11 = scmp.lt.s32.totalorder %s478_s25, %s478_s25 }
  0x1d   :  { %v96_v3 = vld [vmem:[#allocation5 + $0x178] sm:$0xff]  ;;  %490 = vmatpush3.msra.mxu0 %v64_v2  ;;  %v95_v7 = vld [vmem:[#allocation5 + $0x170] sm:$0xff]  ;;  %v62_v10 = vld [vmem:[#allocation5 + $0x68] sm:$0xff] }
  0x1e   :  { %525 = vmatpush3.msra.mxu1 %v96_v3  ;;  %491 = vmatprep.subr.mxu0 %v79_v4  ;;  %v94_v11 = vld [vmem:[#allocation5 + $0x168] sm:$0xff]  ;;  %v77_v12 = vld [vmem:[#allocation5 + $0xe0] sm:$0xff]  ;;  %v76_v16 = vld [vmem:[#allocation5 + $0xd8] sm:$0xff] }
  0x1f   :  { %526 = vmatprep.subr.mxu1 %v111_v5  ;;  %492 = vmatpush3.msra.mxu0 %v63_v6  ;;  %v109_v13 = vld [vmem:[#allocation5 + $0x1e0] sm:$0xff]  ;;  %v108_v17 = vld [vmem:[#allocation5 + $0x1d8] sm:$0xff]  ;;  %v75_v20 = vld [vmem:[#allocation5 + $0xd0] sm:$0xff] }
  0x20   :  { %527 = vmatpush3.msra.mxu1 %v95_v7  ;;  %493 = vmatprep.subr.mxu0 %v78_v8  ;;  %v61_v14 = vld [vmem:[#allocation5 + $0x60] sm:$0xff]  ;;  %v60_v18 = vld [vmem:[#allocation5 + $0x58] sm:$0xff]  ;;  %v107_v21 = vld [vmem:[#allocation5 + $0x1d0] sm:$0xff] }
  0x21   :  { %528 = vmatprep.subr.mxu1 %v110_v9  ;;  %v93_v15 = vld [vmem:[#allocation5 + $0x160] sm:$0xff]  ;;  %494 = vmatpush3.msra.mxu0 %v62_v10  ;;  %v92_v19 = vld [vmem:[#allocation5 + $0x158] sm:$0xff]  ;;  %v59_v22 = vld [vmem:[#allocation5 + $0x50] sm:$0xff] }
  0x22   :  { %529 = vmatpush3.msra.mxu1 %v94_v11  ;;  %495 = vmatprep.subr.mxu0 %v77_v12  ;;  %v91_v23 = vld [vmem:[#allocation5 + $0x150] sm:$0xff]  ;;  %v74_v24 = vld [vmem:[#allocation5 + $0xc8] sm:$0xff]  ;;  %v73_v28 = vld [vmem:[#allocation5 + $0xc0] sm:$0xff] }
  0x23   :  { %530 = vmatprep.subr.mxu1 %v109_v13  ;;  %496 = vmatpush3.msra.mxu0 %v61_v14  ;;  %v106_v25 = vld [vmem:[#allocation5 + $0x1c8] sm:$0xff]  ;;  %v105_v29 = vld [vmem:[#allocation5 + $0x1c0] sm:$0xff]  ;;  %v72_v32 = vld [vmem:[#allocation5 + $0xb8] sm:$0xff] }
  0x24   :  { %531 = vmatpush3.msra.mxu1 %v93_v15  ;;  %497 = vmatprep.subr.mxu0 %v76_v16  ;;  %v58_v26 = vld [vmem:[#allocation5 + $0x48] sm:$0xff]  ;;  %v57_v30 = vld [vmem:[#allocation5 + $0x40] sm:$0xff]  ;;  %v104_v33 = vld [vmem:[#allocation5 + $0x1b8] sm:$0xff] }
  0x25   :  { %532 = vmatprep.subr.mxu1 %v108_v17  ;;  %498 = vmatpush3.msra.mxu0 %v60_v18  ;;  %v90_v27 = vld [vmem:[#allocation5 + $0x148] sm:$0xff]  ;;  %v89_v31 = vld [vmem:[#allocation5 + $0x140] sm:$0xff]  ;;  %v56_v34 = vld [vmem:[#allocation5 + $0x38] sm:$0xff] }
  0x26   :  { %533 = vmatpush3.msra.mxu1 %v92_v19  ;;  %499 = vmatprep.subr.mxu0 %v75_v20  ;;  %v88_v35 = vld [vmem:[#allocation5 + $0x138] sm:$0xff]  ;;  %v71_v36 = vld [vmem:[#allocation5 + $0xb0] sm:$0xff]  ;;  %v70_v40 = vld [vmem:[#allocation5 + $0xa8] sm:$0xff] }
  0x27   :  { %534 = vmatprep.subr.mxu1 %v107_v21  ;;  %500 = vmatpush3.msra.mxu0 %v59_v22  ;;  %v103_v37 = vld [vmem:[#allocation5 + $0x1b0] sm:$0xff]  ;;  %v102_v41 = vld [vmem:[#allocation5 + $0x1a8] sm:$0xff]  ;;  %v69_v44 = vld [vmem:[#allocation5 + $0xa0] sm:$0xff] }
  0x28   :  { %535 = vmatpush3.msra.mxu1 %v91_v23  ;;  %501 = vmatprep.subr.mxu0 %v74_v24  ;;  %v55_v38 = vld [vmem:[#allocation5 + $0x30] sm:$0xff]  ;;  %v54_v42 = vld [vmem:[#allocation5 + $0x28] sm:$0xff]  ;;  %v101_v45 = vld [vmem:[#allocation5 + $0x1a0] sm:$0xff] }
  0x29   :  { %536 = vmatprep.subr.mxu1 %v106_v25  ;;  %502 = vmatpush3.msra.mxu0 %v58_v26  ;;  %v87_v39 = vld [vmem:[#allocation5 + $0x130] sm:$0xff]  ;;  %v86_v43 = vld [vmem:[#allocation5 + $0x128] sm:$0xff]  ;;  %v53_v46 = vld [vmem:[#allocation5 + $0x20] sm:$0xff] }
  0x2a   :  { %537 = vmatpush3.msra.mxu1 %v90_v27  ;;  %503 = vmatprep.subr.mxu0 %v73_v28  ;;  %v85_v47 = vld [vmem:[#allocation5 + $0x120] sm:$0xff]  ;;  %v68_v48 = vld [vmem:[#allocation5 + $0x98] sm:$0xff]  ;;  %v67_v52 = vld [vmem:[#allocation5 + $0x90] sm:$0xff] }
  0x2b   :  { %538 = vmatprep.subr.mxu1 %v105_v29  ;;  %504 = vmatpush3.msra.mxu0 %v57_v30  ;;  %v100_v49 = vld [vmem:[#allocation5 + $0x198] sm:$0xff]  ;;  %v99_v53 = vld [vmem:[#allocation5 + $0x190] sm:$0xff]  ;;  %v66_v56 = vld [vmem:[#allocation5 + $0x88] sm:$0xff] }
  0x2c   :  { %539 = vmatpush3.msra.mxu1 %v89_v31  ;;  %505 = vmatprep.subr.mxu0 %v72_v32  ;;  %v52_v50 = vld [vmem:[#allocation5 + $0x18] sm:$0xff]  ;;  %v51_v54 = vld [vmem:[#allocation5 + $0x10] sm:$0xff]  ;;  %v98_v57 = vld [vmem:[#allocation5 + $0x188] sm:$0xff] }
  0x2d   :  { %540 = vmatprep.subr.mxu1 %v104_v33  ;;  %506 = vmatpush3.msra.mxu0 %v56_v34  ;;  %v84_v51 = vld [vmem:[#allocation5 + $0x118] sm:$0xff]  ;;  %v83_v55 = vld [vmem:[#allocation5 + $0x110] sm:$0xff]  ;;  %v50_v58 = vld [vmem:[#allocation5 + $0x8] sm:$0xff] }
  0x2e   :  { %541 = vmatpush3.msra.mxu1 %v88_v35  ;;  %507 = vmatprep.subr.mxu0 %v71_v36  ;;  %v82_v59 = vld [vmem:[#allocation5 + $0x108] sm:$0xff]  ;;  %v65_v60 = vld [vmem:[#allocation5 + $0x80] sm:$0xff]  ;;  %v44_v2 = vld [vmem:[#allocation2 + $0x18] sm:$0xff] }
  0x2f   :  { %542 = vmatprep.subr.mxu1 %v103_v37  ;;  %508 = vmatpush3.msra.mxu0 %v55_v38  ;;  %v97_v61 = vld [vmem:[#allocation5 + $0x180] sm:$0xff]  ;;  %v42_v63 = vld [vmem:[#allocation2 + $0x8] sm:$0xff]  ;;  %v144_v3 = vld [vmem:[#allocation5 + $0x2f8] sm:$0xff] }
  0x30   :  { %543 = vmatpush3.msra.mxu1 %v87_v39  ;;  %509 = vmatprep.subr.mxu0 %v70_v40  ;;  %v49_v62 = vld [vmem:[#allocation5] sm:$0xff]  ;;  %v176_v4 = vld [vmem:[#allocation5 + $0x3f8] sm:$0xff]  ;;  %v43_v5 = vld [vmem:[#allocation2 + $0x10] sm:$0xff] }
  0x31   :  { %544 = vmatprep.subr.mxu1 %v102_v41  ;;  %510 = vmatpush3.msra.mxu0 %v54_v42  ;;  %v81_v0 = vld [vmem:[#allocation5 + $0x100] sm:$0xff]  ;;  %v128_v6 = vld [vmem:[#allocation5 + $0x278] sm:$0xff]  ;;  %v143_v8 = vld [vmem:[#allocation5 + $0x2f0] sm:$0xff] }
  0x32   :  { %545 = vmatpush3.msra.mxu1 %v86_v43  ;;  %511 = vmatprep.subr.mxu0 %v69_v44  ;;  %v41_v1 = vld [vmem:[#allocation2] sm:$0xff]  ;;  %v160_v7 = vld [vmem:[#allocation5 + $0x378] sm:$0xff]  ;;  %v175_v9 = vld [vmem:[#allocation5 + $0x3f0] sm:$0xff] }
  0x33   :  { %546 = vmatprep.subr.mxu1 %v101_v45  ;;  %512 = vmatpush3.msra.mxu0 %v53_v46  ;;  %v127_v10 = vld [vmem:[#allocation5 + $0x270] sm:$0xff]  ;;  %v142_v12 = vld [vmem:[#allocation5 + $0x2e8] sm:$0xff]  ;;  %v141_v16 = vld [vmem:[#allocation5 + $0x2e0] sm:$0xff] }
  0x34   :  { %547 = vmatpush3.msra.mxu1 %v85_v47  ;;  %513 = vmatprep.subr.mxu0 %v68_v48  ;;  %v159_v11 = vld [vmem:[#allocation5 + $0x370] sm:$0xff]  ;;  %v174_v13 = vld [vmem:[#allocation5 + $0x3e8] sm:$0xff]  ;;  %v173_v17 = vld [vmem:[#allocation5 + $0x3e0] sm:$0xff] }
  0x35   :  { %548 = vmatprep.subr.mxu1 %v100_v49  ;;  %514 = vmatpush3.msra.mxu0 %v52_v50  ;;  %v126_v14 = vld [vmem:[#allocation5 + $0x268] sm:$0xff]  ;;  %v125_v18 = vld [vmem:[#allocation5 + $0x260] sm:$0xff]  ;;  %v140_v20 = vld [vmem:[#allocation5 + $0x2d8] sm:$0xff] }
  0x36   :  { %549 = vmatpush3.msra.mxu1 %v84_v51  ;;  %515 = vmatprep.subr.mxu0 %v67_v52  ;;  %v158_v15 = vld [vmem:[#allocation5 + $0x368] sm:$0xff]  ;;  %v157_v19 = vld [vmem:[#allocation5 + $0x360] sm:$0xff]  ;;  %v172_v21 = vld [vmem:[#allocation5 + $0x3d8] sm:$0xff] }
  0x37   :  { %550 = vmatprep.subr.mxu1 %v99_v53  ;;  %516 = vmatpush3.msra.mxu0 %v51_v54  ;;  %v124_v22 = vld [vmem:[#allocation5 + $0x258] sm:$0xff]  ;;  %v139_v24 = vld [vmem:[#allocation5 + $0x2d0] sm:$0xff]  ;;  %v138_v28 = vld [vmem:[#allocation5 + $0x2c8] sm:$0xff] }
  0x38   :  { %551 = vmatpush3.msra.mxu1 %v83_v55  ;;  %517 = vmatprep.subr.mxu0 %v66_v56  ;;  %v156_v23 = vld [vmem:[#allocation5 + $0x358] sm:$0xff]  ;;  %v171_v25 = vld [vmem:[#allocation5 + $0x3d0] sm:$0xff]  ;;  %v170_v29 = vld [vmem:[#allocation5 + $0x3c8] sm:$0xff] }
  0x39   :  { %552 = vmatprep.subr.mxu1 %v98_v57  ;;  %518 = vmatpush3.msra.mxu0 %v50_v58  ;;  %v123_v26 = vld [vmem:[#allocation5 + $0x250] sm:$0xff]  ;;  %v122_v30 = vld [vmem:[#allocation5 + $0x248] sm:$0xff]  ;;  %v137_v32 = vld [vmem:[#allocation5 + $0x2c0] sm:$0xff] }
  0x3a   :  { %553 = vmatpush3.msra.mxu1 %v82_v59  ;;  %519 = vmatprep.subr.mxu0 %v65_v60  ;;  %v155_v27 = vld [vmem:[#allocation5 + $0x350] sm:$0xff]  ;;  %v154_v31 = vld [vmem:[#allocation5 + $0x348] sm:$0xff]  ;;  %v169_v33 = vld [vmem:[#allocation5 + $0x3c0] sm:$0xff] }
  0x3b   :  { %554 = vmatprep.subr.mxu1 %v97_v61  ;;  %520 = vmatpush3.msra.mxu0 %v49_v62  ;;  %v121_v34 = vld [vmem:[#allocation5 + $0x240] sm:$0xff]  ;;  %v136_v36 = vld [vmem:[#allocation5 + $0x2b8] sm:$0xff]  ;;  %v135_v40 = vld [vmem:[#allocation5 + $0x2b0] sm:$0xff] }
  0x3c   :  { %248 = vmatprep.mubr.f32.mxu0 %v42_v63  ;;  %555 = vmatpush3.msra.mxu1 %v81_v0  ;;  %v153_v35 = vld [vmem:[#allocation5 + $0x340] sm:$0xff]  ;;  %v168_v37 = vld [vmem:[#allocation5 + $0x3b8] sm:$0xff]  ;;  %v167_v41 = vld [vmem:[#allocation5 + $0x3b0] sm:$0xff] }
  0x3d   :  { %249 = vmatmul.mubr.f32.vlgmr.msra.gmra.mxu0 %v41_v1  ;;  %318 = vmatprep.mubr.f32.mxu1 %v44_v2  ;;  %v120_v38 = vld [vmem:[#allocation5 + $0x238] sm:$0xff]  ;;  %v119_v42 = vld [vmem:[#allocation5 + $0x230] sm:$0xff]  ;;  %v134_v44 = vld [vmem:[#allocation5 + $0x2a8] sm:$0xff] }
  0x3e   :  { %559 = vmatprep.subr.mxu0 %v144_v3  ;;  %594 = vmatprep.subr.mxu1 %v176_v4  ;;  %v152_v39 = vld [vmem:[#allocation5 + $0x338] sm:$0xff]  ;;  %v151_v43 = vld [vmem:[#allocation5 + $0x330] sm:$0xff]  ;;  %v166_v45 = vld [vmem:[#allocation5 + $0x3a8] sm:$0xff] }
  0x3f   :  { %319 = vmatmul.mubr.f32.vlgmr.msra.gmra.mxu1 %v43_v5  ;;  %560 = vmatpush3.msra.mxu0 %v128_v6  ;;  %v118_v46 = vld [vmem:[#allocation5 + $0x228] sm:$0xff]  ;;  %v133_v48 = vld [vmem:[#allocation5 + $0x2a0] sm:$0xff]  ;;  %v132_v52 = vld [vmem:[#allocation5 + $0x298] sm:$0xff] }
  0x40   :  { %595 = vmatpush3.msra.mxu1 %v160_v7  ;;  %561 = vmatprep.subr.mxu0 %v143_v8  ;;  %v150_v47 = vld [vmem:[#allocation5 + $0x328] sm:$0xff]  ;;  %v165_v49 = vld [vmem:[#allocation5 + $0x3a0] sm:$0xff]  ;;  %v164_v53 = vld [vmem:[#allocation5 + $0x398] sm:$0xff] }
  0x41   :  { %596 = vmatprep.subr.mxu1 %v175_v9  ;;  %562 = vmatpush3.msra.mxu0 %v127_v10  ;;  %v117_v50 = vld [vmem:[#allocation5 + $0x220] sm:$0xff]  ;;  %v116_v54 = vld [vmem:[#allocation5 + $0x218] sm:$0xff]  ;;  %v131_v56 = vld [vmem:[#allocation5 + $0x290] sm:$0xff] }
  0x42   :  { %597 = vmatpush3.msra.mxu1 %v159_v11  ;;  %563 = vmatprep.subr.mxu0 %v142_v12  ;;  %v149_v51 = vld [vmem:[#allocation5 + $0x320] sm:$0xff]  ;;  %v148_v55 = vld [vmem:[#allocation5 + $0x318] sm:$0xff]  ;;  %v163_v57 = vld [vmem:[#allocation5 + $0x390] sm:$0xff] }
  0x43   :  { %598 = vmatprep.subr.mxu1 %v174_v13  ;;  %564 = vmatpush3.msra.mxu0 %v126_v14  ;;  %v115_v58 = vld [vmem:[#allocation5 + $0x210] sm:$0xff]  ;;  %v130_v60 = vld [vmem:[#allocation5 + $0x288] sm:$0xff]  ;;  %v129_v0 = vld [vmem:[#allocation5 + $0x280] sm:$0xff] }
  0x44   :  { %599 = vmatpush3.msra.mxu1 %v158_v15  ;;  %565 = vmatprep.subr.mxu0 %v141_v16  ;;  %v147_v59 = vld [vmem:[#allocation5 + $0x310] sm:$0xff]  ;;  %v162_v61 = vld [vmem:[#allocation5 + $0x388] sm:$0xff]  ;;  %v161_v1 = vld [vmem:[#allocation5 + $0x380] sm:$0xff] }
  0x45   :  { %600 = vmatprep.subr.mxu1 %v173_v17  ;;  %566 = vmatpush3.msra.mxu0 %v125_v18  ;;  %v114_v62 = vld [vmem:[#allocation5 + $0x208] sm:$0xff]  ;;  %v113_v2 = vld [vmem:[#allocation5 + $0x200] sm:$0xff]  ;;  %v48_v5 = vld [vmem:[#allocation2 + $0x38] sm:$0xff] }
  0x46   :  { %601 = vmatpush3.msra.mxu1 %v157_v19  ;;  %567 = vmatprep.subr.mxu0 %v140_v20  ;;  %v146_v63 = vld [vmem:[#allocation5 + $0x308] sm:$0xff]  ;;  %v145_v4 = vld [vmem:[#allocation5 + $0x300] sm:$0xff]  ;;  %v47_v7 = vld [vmem:[#allocation2 + $0x30] sm:$0xff] }
  0x47   :  { %602 = vmatprep.subr.mxu1 %v172_v21  ;;  %568 = vmatpush3.msra.mxu0 %v124_v22  ;;  %v46_v3 = vld [vmem:[#allocation2 + $0x28] sm:$0xff]  ;;  %v45_v6 = vld [vmem:[#allocation2 + $0x20] sm:$0xff] }
  0x48   :  { %603 = vmatpush3.msra.mxu1 %v156_v23  ;;  %569 = vmatprep.subr.mxu0 %v139_v24  ;;  %v487_v12 = vld [vmem:[%s743_s2] ss:$0 sm:$0xff]  ;;  %s678_s2 = scalar_lea.vmem %s478_s25, 128 }
  0x49   :  { %604 = vmatprep.subr.mxu1 %v171_v25  ;;  %570 = vmatpush3.msra.mxu0 %v123_v26  ;;  %p679_p10 = scmp.ne.s32.totalorder %s478_s25, %s678_s2  ;;  %p684_p12 = scmp.lt.s32.totalorder %s678_s2, %s678_s2 }
  0x4a   :  { %605 = vmatpush3.msra.mxu1 %v155_v27  ;;  %571 = vmatprep.subr.mxu0 %v138_v28 }
  0x4b   :  { %606 = vmatprep.subr.mxu1 %v170_v29  ;;  %572 = vmatpush3.msra.mxu0 %v122_v30  ;;  %p685_p13 = por %p684_p12, %p683_p11 }
  0x4c   :  { %607 = vmatpush3.msra.mxu1 %v154_v31  ;;  %573 = vmatprep.subr.mxu0 %v137_v32 }
  0x4d   :  { %608 = vmatprep.subr.mxu1 %v169_v33  ;;  %574 = vmatpush3.msra.mxu0 %v121_v34  ;;  %p686_p0 = pnand %p685_p13, %p679_p10 }
  0x4e   :  { %609 = vmatpush3.msra.mxu1 %v153_v35  ;;  %575 = vmatprep.subr.mxu0 %v136_v36 }
  0x4f   :  { %610 = vmatprep.subr.mxu1 %v168_v37  ;;  %576 = vmatpush3.msra.mxu0 %v120_v38 }
  0x50   :  { %611 = vmatpush3.msra.mxu1 %v152_v39  ;;  %577 = vmatprep.subr.mxu0 %v135_v40 }
  0x51   :  { %612 = vmatprep.subr.mxu1 %v167_v41  ;;  %578 = vmatpush3.msra.mxu0 %v119_v42 }
  0x52   :  { %613 = vmatpush3.msra.mxu1 %v151_v43  ;;  %579 = vmatprep.subr.mxu0 %v134_v44 }
  0x53   :  { %614 = vmatprep.subr.mxu1 %v166_v45  ;;  %580 = vmatpush3.msra.mxu0 %v118_v46 }
  0x54   :  { %615 = vmatpush3.msra.mxu1 %v150_v47  ;;  %581 = vmatprep.subr.mxu0 %v133_v48 }
  0x55   :  { %616 = vmatprep.subr.mxu1 %v165_v49  ;;  %582 = vmatpush3.msra.mxu0 %v117_v50 }
  0x56   :  { %617 = vmatpush3.msra.mxu1 %v149_v51  ;;  %583 = vmatprep.subr.mxu0 %v132_v52 }
  0x57   :  { %618 = vmatprep.subr.mxu1 %v164_v53  ;;  %584 = vmatpush3.msra.mxu0 %v116_v54 }
  0x58   :  { %619 = vmatpush3.msra.mxu1 %v148_v55  ;;  %585 = vmatprep.subr.mxu0 %v131_v56 }
  0x59   :  { %620 = vmatprep.subr.mxu1 %v163_v57  ;;  %586 = vmatpush3.msra.mxu0 %v115_v58 }
  0x5a   :  { %621 = vmatpush3.msra.mxu1 %v147_v59  ;;  %587 = vmatprep.subr.mxu0 %v130_v60 }
  0x5b   :  { %622 = vmatprep.subr.mxu1 %v162_v61  ;;  %588 = vmatpush3.msra.mxu0 %v114_v62 }
  0x5c   :  { %623 = vmatpush3.msra.mxu1 %v146_v63  ;;  %589 = vmatprep.subr.mxu0 %v129_v0 }
  0x5d   :  { %624 = vmatprep.subr.mxu1 %v161_v1  ;;  %590 = vmatpush3.msra.mxu0 %v113_v2 }
  0x5e   :  { %388 = vmatprep.mubr.f32.mxu0 %v46_v3  ;;  %625 = vmatpush3.msra.mxu1 %v145_v4 }
  0x5f   :  { %458 = vmatprep.mubr.f32.mxu1 %v48_v5  ;;  %389 = vmatmul.mubr.f32.vlgmr.msra.gmra.mxu0 %v45_v6 }
  0x60   :  { %459 = vmatmul.mubr.f32.vlgmr.msra.gmra.mxu1 %v47_v7 }
  0xfd   :  { %v521_v8 = vpop.f32.mrf.mxu0 }
  0xff   :  { %v556_v9 = vpop.f32.mrf.mxu1  ;;  %v522_v10 = vpop.f32.mrf.mxu0 }
 0x100   :  { %v523_v11 = vadd.f32 %v522_v10, %v521_v8 }
 0x101   :  { %v557_v13 = vpop.f32.mrf.mxu1 }
 0x102   :  { %v251_v14 = vadd.f32 %v523_v11, %v487_v12  ;;  %v558_v15 = vadd.f32 %v557_v13, %v556_v9 }
 0x104   :  { %v321_v20 = vadd.f32 %v558_v15, %v251_v14 }
 0x11f   :  { %v591_v16 = vpop.f32.mrf.mxu0 }
 0x120   :  { %v626_v17 = vpop.f32.mrf.mxu1 }
 0x121   :  { %v592_v18 = vpop.f32.mrf.mxu0 }
 0x122   :  { %v627_v19 = vpop.f32.mrf.mxu1  ;;  %v593_v21 = vadd.f32 %v592_v18, %v591_v16 }
 0x123   :  { %v628_v23 = vadd.f32 %v627_v19, %v626_v17 }
 0x124   :  { %v391_v22 = vadd.f32 %v593_v21, %v321_v20 }
 0x126   :  { %v461_v24 = vadd.f32 %v628_v23, %v391_v22 }
 0x128   :  { %v488_v25 = vmul.f32 -1.442695, %v461_v24 }
 0x12a   :  { %634 = vpow2.f32 %v488_v25 }
 0x137   :  { %v635_v26 = vpop.eup %634 }
 0x138   :  { %v467_v27 = vadd.f32 1.0, %v635_v26 }
 0x13a   :  { %636 = vrcp.f32 %v467_v27 }
 0x147   :  { %v637_v28 = vpop.eup %636 }
 0x148   :  { %470 = vst [vmem:[#allocation7] sm:$0xff] %v637_v28 }
 0x149   :  { %689 = shalt.err (!%p686_p0)
}
 0x14a   :  { %480 = dma.vmem_to_hbm [thread:$0]  %s478_s25, 128, %s744_s3, [#allocation4]  }
 0x14b   :  { %702 = dma.done.wait [#allocation4], 128  }
 0x14c   :  { %703 = vsyncadd [#allocation4], 4294967168 }
 0x14d   :  { %484 = vsyncpa [#allocation3], 1 }
 0x14e   :  { %485 = vsyncpa [#allocation6], 1 }
 0x14f   :  { %486 = vsyncpa [#allocation4], 1 }

</bundles_post_ra>
